<compile_context>
chip_gen: v6e
topology: v6e:2x2x1
jax: 0.10.0
libtpu: 0.0.40
codegen_flags: <defaults>
</compile_context>

<pallas_src>
import functools

import jax
import jax.numpy as jnp
from jax.experimental import pallas as pl
from jax.experimental.pallas import tpu as pltpu

LANE = 128  # TPU lane width; action dim is padded up to this for the fc2 matmul


def _round_up(n, m):
    return ((n + m - 1) // m) * m


def qnet_kernel(x_ref, w1_ref, b1_ref, w2_ref, b2_ref, o_ref):
    # x_ref : (TB, S)      batch tile of states
    # w1_ref: (S, H)       resident across all grid steps (constant index_map)
    # b1_ref: (1, H)
    # w2_ref: (H, Npad)    action dim padded to a full 128-lane slab
    # b2_ref: (1, Npad)
    # o_ref : (TB, A)      narrow (real action_dim) output store
    x = x_ref[...]
    w1 = w1_ref[...]
    tb = x.shape[0]
    state_dim, hidden = w1.shape

    # --- fc1 + ReLU: K = state_dim (tiny) -> VPU broadcast-FMAs, not the MXU ---
    h = jnp.broadcast_to(b1_ref[...], (tb, hidden))          # hoisted, done once
    for k in range(state_dim):                               # static unrolled loop
        h = h + x[:, k:k + 1] * w1[k:k + 1, :]
    h = jnp.maximum(h, 0.0)

    # --- fc2: K = hidden (128), N padded to 128 -> proper MXU shape ---
    q = jnp.dot(h, w2_ref[...], preferred_element_type=jnp.float32)
    q = q + b2_ref[...]

    # Narrow store: only the real action columns go back to HBM (masked vst is
    # per-vreg cost; HBM writeback shrinks ~64x).
    n_real = o_ref.shape[1]
    o_ref[...] = q[:, :n_real].astype(o_ref.dtype)


@functools.partial(jax.jit, static_argnames=("action_dim", "block_batch"))
def qnet_forward(x, w1, b1, w2p, b2p, *, action_dim, block_batch=8192):
    """Fused Qnet forward.  w2p/b2p are the lane-padded params from init_params."""
    batch, state_dim = x.shape
    hidden_dim, n_pad = w2p.shape

    # Batch tile: multiple of 8 sublanes.  Default block_batch collapses the grid
    # to a single step for small/medium batches; Pallas masks the ragged tail, so
    # no explicit x padding or output row-slice is needed.
    tb = _round_up(min(block_batch, batch), 8)
    grid = (pl.cdiv(batch, tb),)

    flops = 2 * batch * (state_dim * hidden_dim + hidden_dim * n_pad)
    bytes_accessed = 4 * (x.size + w1.size + b1.size + w2p.size + b2p.size
                          + batch * action_dim)

    out = pl.pallas_call(
        qnet_kernel,
        out_shape=jax.ShapeDtypeStruct((batch, action_dim), jnp.float32),
        grid=grid,
        in_specs=[
            pl.BlockSpec((tb, state_dim), lambda i: (i, 0)),          # x: batch-tiled
            pl.BlockSpec((state_dim, hidden_dim), lambda i: (0, 0)),  # W1 resident
            pl.BlockSpec((1, hidden_dim), lambda i: (0, 0)),          # b1 resident
            pl.BlockSpec((hidden_dim, n_pad), lambda i: (0, 0)),      # W2 resident
            pl.BlockSpec((1, n_pad), lambda i: (0, 0)),               # b2 resident
        ],
        out_specs=pl.BlockSpec((tb, action_dim), lambda i: (i, 0)),
        compiler_params=pltpu.CompilerParams(
            # Batch axis is embarrassingly parallel (v7x can shard grid steps
            # across its 2 TensorCores when block_batch is lowered for big batches).
            dimension_semantics=("parallel",),
        ),
        cost_estimate=pl.CostEstimate(
            flops=flops, transcendentals=0, bytes_accessed=bytes_accessed),
    )(x, w1, b1, w2p, b2p)
    return out


def init_params(key, state_dim, hidden_dim, action_dim):
    # Deterministic init mimicking torch.nn.Linear: U(-1/sqrt(fan_in), 1/sqrt(fan_in)).
    # Weights stored (in, out) so the kernel does x @ W (PyTorch stores (out, in)).
    # W2/b2 are lane-padded ONCE here so the per-call forward does no padding ops.
    k1, k2, k3, k4 = jax.random.split(key, 4)
    lim1 = 1.0 / jnp.sqrt(jnp.float32(state_dim))
    lim2 = 1.0 / jnp.sqrt(jnp.float32(hidden_dim))
    w1 = jax.random.uniform(k1, (state_dim, hidden_dim), jnp.float32, -lim1, lim1)
    b1 = jax.random.uniform(k2, (1, hidden_dim), jnp.float32, -lim1, lim1)
    w2 = jax.random.uniform(k3, (hidden_dim, action_dim), jnp.float32, -lim2, lim2)
    b2 = jax.random.uniform(k4, (1, action_dim), jnp.float32, -lim2, lim2)

    n_pad = _round_up(max(action_dim, 1), LANE)
    w2p = jnp.zeros((hidden_dim, n_pad), jnp.float32).at[:, :action_dim].set(w2)
    b2p = jnp.zeros((1, n_pad), jnp.float32).at[:, :action_dim].set(b2)
    return w1, b1, w2p, b2p


if __name__ == "__main__":
    state_dim, hidden_dim, action_dim = 4, 128, 2
    batch = 200  # not a power of two; handled by the ragged last block (grid=(1,))

    key = jax.random.PRNGKey(0)
    kx, kp = jax.random.split(key)
    x = jax.random.normal(kx, (batch, state_dim), jnp.float32)
    w1, b1, w2p, b2p = init_params(kp, state_dim, hidden_dim, action_dim)

    out = qnet_forward(x, w1, b1, w2p, b2p, action_dim=action_dim)
    jax.block_until_ready(out)

    # Reference check in plain JAX (same math as the PyTorch forward).
    w2 = w2p[:, :action_dim]
    b2 = b2p[:, :action_dim]
    ref = jnp.maximum(x @ w1 + b1, 0.0) @ w2 + b2
    assert out.shape == (batch, action_dim)
    assert jnp.allclose(out, ref, atol=1e-4, rtol=1e-4), float(jnp.max(jnp.abs(out - ref)))

    print("KERNEL_OK")
</pallas_src>

<mosaic_0001>
module attributes {stable_mosaic.version = 11 : i64} {
  func.func @qnet_kernel(%arg0: i32, %arg1: memref<200x4xf32, #tpu.memory_space<vmem>>, %arg2: memref<4x128xf32, #tpu.memory_space<vmem>>, %arg3: memref<1x128xf32, #tpu.memory_space<vmem>>, %arg4: memref<128x128xf32, #tpu.memory_space<vmem>>, %arg5: memref<1x128xf32, #tpu.memory_space<vmem>>, %arg6: memref<200x2xf32, #tpu.memory_space<vmem>>) attributes {dimension_semantics = [#tpu.dimension_semantics<parallel>], iteration_bounds = array<i64: 1>, scalar_prefetch = 0 : i64, scratch_operands = 0 : i64, tpu.core_type = #tpu.core_type<tc>, window_params = [{transform_indices = @transform_0, window_bounds = array<i64: 200, 4>}, {pipeline_mode = #tpu.pipeline_mode<synchronous>, transform_indices = @transform_1, window_bounds = array<i64: 4, 128>}, {pipeline_mode = #tpu.pipeline_mode<synchronous>, transform_indices = @transform_2, window_bounds = array<i64: 1, 128>}, {pipeline_mode = #tpu.pipeline_mode<synchronous>, transform_indices = @transform_3, window_bounds = array<i64: 128, 128>}, {pipeline_mode = #tpu.pipeline_mode<synchronous>, transform_indices = @transform_4, window_bounds = array<i64: 1, 128>}, {transform_indices = @transform_5, window_bounds = array<i64: 200, 2>}]} {
    %c0 = arith.constant 0 : index
    %c0_0 = arith.constant 0 : index
    %0 = vector.load %arg1[%c0, %c0_0] : memref<200x4xf32, #tpu.memory_space<vmem>>, vector<200x4xf32>
    %c0_1 = arith.constant 0 : index
    %c0_2 = arith.constant 0 : index
    %1 = vector.load %arg2[%c0_1, %c0_2] : memref<4x128xf32, #tpu.memory_space<vmem>>, vector<4x128xf32>
    %c0_3 = arith.constant 0 : index
    %c0_4 = arith.constant 0 : index
    %2 = vector.load %arg3[%c0_3, %c0_4] : memref<1x128xf32, #tpu.memory_space<vmem>>, vector<1x128xf32>
    %3 = vector.shape_cast %2 : vector<1x128xf32> to vector<1x128xf32>
    %4 = vector.broadcast %3 : vector<1x128xf32> to vector<200x128xf32>
    %5 = vector.extract_strided_slice %0 {offsets = [0, 0], sizes = [200, 1], strides = [1, 1]} : vector<200x4xf32> to vector<200x1xf32>
    %6 = vector.extract_strided_slice %1 {offsets = [0, 0], sizes = [1, 128], strides = [1, 1]} : vector<4x128xf32> to vector<1x128xf32>
    %7 = vector.broadcast %5 : vector<200x1xf32> to vector<200x128xf32>
    %8 = vector.broadcast %6 : vector<1x128xf32> to vector<200x128xf32>
    %9 = arith.mulf %7, %8 : vector<200x128xf32>
    %10 = arith.addf %4, %9 : vector<200x128xf32>
    %11 = vector.extract_strided_slice %0 {offsets = [0, 1], sizes = [200, 1], strides = [1, 1]} : vector<200x4xf32> to vector<200x1xf32>
    %12 = vector.extract_strided_slice %1 {offsets = [1, 0], sizes = [1, 128], strides = [1, 1]} : vector<4x128xf32> to vector<1x128xf32>
    %13 = vector.broadcast %11 : vector<200x1xf32> to vector<200x128xf32>
    %14 = vector.broadcast %12 : vector<1x128xf32> to vector<200x128xf32>
    %15 = arith.mulf %13, %14 : vector<200x128xf32>
    %16 = arith.addf %10, %15 : vector<200x128xf32>
    %17 = vector.extract_strided_slice %0 {offsets = [0, 2], sizes = [200, 1], strides = [1, 1]} : vector<200x4xf32> to vector<200x1xf32>
    %18 = vector.extract_strided_slice %1 {offsets = [2, 0], sizes = [1, 128], strides = [1, 1]} : vector<4x128xf32> to vector<1x128xf32>
    %19 = vector.broadcast %17 : vector<200x1xf32> to vector<200x128xf32>
    %20 = vector.broadcast %18 : vector<1x128xf32> to vector<200x128xf32>
    %21 = arith.mulf %19, %20 : vector<200x128xf32>
    %22 = arith.addf %16, %21 : vector<200x128xf32>
    %23 = vector.extract_strided_slice %0 {offsets = [0, 3], sizes = [200, 1], strides = [1, 1]} : vector<200x4xf32> to vector<200x1xf32>
    %24 = vector.extract_strided_slice %1 {offsets = [3, 0], sizes = [1, 128], strides = [1, 1]} : vector<4x128xf32> to vector<1x128xf32>
    %25 = vector.broadcast %23 : vector<200x1xf32> to vector<200x128xf32>
    %26 = vector.broadcast %24 : vector<1x128xf32> to vector<200x128xf32>
    %27 = arith.mulf %25, %26 : vector<200x128xf32>
    %28 = arith.addf %22, %27 : vector<200x128xf32>
    %cst = arith.constant 0.000000e+00 : f32
    %29 = vector.broadcast %cst : f32 to vector<200x128xf32>
    %30 = arith.maximumf %28, %29 : vector<200x128xf32>
    %c0_5 = arith.constant 0 : index
    %c0_6 = arith.constant 0 : index
    %31 = vector.load %arg4[%c0_5, %c0_6] : memref<128x128xf32, #tpu.memory_space<vmem>>, vector<128x128xf32>
    %cst_7 = arith.constant dense<0.000000e+00> : vector<200x128xf32>
    %32 = tpu.matmul %30, %31, %cst_7 {dimension_numbers = #tpu.dot_dimension_numbers<[1], [0], [0], [1], [0, 0, 1, 1], [], []>} : vector<200x128xf32>, vector<128x128xf32>, vector<200x128xf32> -> vector<200x128xf32>
    %c0_8 = arith.constant 0 : index
    %c0_9 = arith.constant 0 : index
    %33 = vector.load %arg5[%c0_8, %c0_9] : memref<1x128xf32, #tpu.memory_space<vmem>>, vector<1x128xf32>
    %34 = vector.broadcast %33 : vector<1x128xf32> to vector<200x128xf32>
    %35 = arith.addf %32, %34 : vector<200x128xf32>
    %36 = vector.extract_strided_slice %35 {offsets = [0, 0], sizes = [200, 2], strides = [1, 1]} : vector<200x128xf32> to vector<200x2xf32>
    %c0_10 = arith.constant 0 : index
    %c0_11 = arith.constant 0 : index
    %37 = vector.load %arg6[%c0_10, %c0_11] : memref<200x2xf32, #tpu.memory_space<vmem>>, vector<200x2xf32>
    tpu.vector_store %arg6[%c0_10, %c0_11], %36 {strides = array<i32>} : memref<200x2xf32, #tpu.memory_space<vmem>>, vector<200x2xf32>,
    return
  }
  func.func @transform_0(%arg0: i32) -> (i32, i32) {
    %c0_i32 = arith.constant 0 : i32
    %c0_i32_0 = arith.constant 0 : i32
    return %arg0, %c0_i32 : i32, i32
  }
  func.func @transform_1(%arg0: i32) -> (i32, i32) {
    %c0_i32 = arith.constant 0 : i32
    %c0_i32_0 = arith.constant 0 : i32
    %c0_i32_1 = arith.constant 0 : i32
    return %c0_i32, %c0_i32_0 : i32, i32
  }
  func.func @transform_2(%arg0: i32) -> (i32, i32) {
    %c0_i32 = arith.constant 0 : i32
    %c0_i32_0 = arith.constant 0 : i32
    %c0_i32_1 = arith.constant 0 : i32
    return %c0_i32, %c0_i32_0 : i32, i32
  }
  func.func @transform_3(%arg0: i32) -> (i32, i32) {
    %c0_i32 = arith.constant 0 : i32
    %c0_i32_0 = arith.constant 0 : i32
    %c0_i32_1 = arith.constant 0 : i32
    return %c0_i32, %c0_i32_0 : i32, i32
  }
  func.func @transform_4(%arg0: i32) -> (i32, i32) {
    %c0_i32 = arith.constant 0 : i32
    %c0_i32_0 = arith.constant 0 : i32
    %c0_i32_1 = arith.constant 0 : i32
    return %c0_i32, %c0_i32_0 : i32, i32
  }
  func.func @transform_5(%arg0: i32) -> (i32, i32) {
    %c0_i32 = arith.constant 0 : i32
    %c0_i32_0 = arith.constant 0 : i32
    return %arg0, %c0_i32 : i32, i32
  }
}

</mosaic_0001>

<bundles_post_ra>
// kernel: qnet_forward.1
= control target key start
LH: loop header
LB: loop body
LE: loop exit
PB: predicated region body
PF: predicated region fallthrough
CT: control target
= control target key end

     0   :  { %v2014_v0 = vmov 2   ;;  %v2013_v1 = vmov 0   ;;  %v2016_v21 = vmov 1   ;;  %v2011_v25 = vmov 3   ;;  %s2003_s0 = inlined_call_operand.vmem [shape: f32[200,4], index: 0, kind: input, shape index: {}]   ;;  %s2004_s3 = inlined_call_operand.vmem [shape: f32[128,128], index: 3, kind: input, shape index: {}]   ;;  %s2005_s1 = inlined_call_operand.vmem [shape: f32[4,128], index: 1, kind: input, shape index: {}]   ;;  %s2006_s2 = inlined_call_operand.vmem [shape: f32[1,128], index: 2, kind: input, shape index: {}]   ;;  %s2007_s4 = inlined_call_operand.vmem [shape: f32[1,128], index: 4, kind: input, shape index: {}]   ;;  %s2008_s5 = inlined_call_operand.vmem [shape: f32[200,2], index: 5, kind: output, shape index: {}]  }
   0x1   :  { %1152 = vset.pattern.permute.xlu0 %v2014_v0  ;;  %1150 = vset.pattern.permute.xlu1 %v2013_v1  ;;  %v1237_v2 = vld [vmem:[%s2003_s0 + $0x10] sm:$0xff]  ;;  %v1242_v3 = vld [vmem:[%s2003_s0] sm:$0xff]  ;;  %v1249_v4 = vld [vmem:[%s2003_s0 + $0x18] sm:$0xff]  ;;  %v2009_v26 = vmov 0.0   ;;  %vm1201_vm0 = vmmov 0   ;;  %v178_v56 = vlaneseq  ;;  %vm932_vm1 = vcmask 15360  }
   0x2   :  { %65 = vperm.xlu1 %1150, %v1237_v2   ;;  %387 = vperm.xlu0 %1152, %v1242_v3   ;;  %v1254_v5 = vld [vmem:[%s2003_s0 + $0xa0] sm:$0xff]  ;;  %v1261_v6 = vld [vmem:[%s2003_s0 + $0x28] sm:$0xff]  ;;  %v1273_v8 = vld [vmem:[%s2003_s0 + $0x38] sm:$0xff] }
   0x3   :  { %v1266_v7 = vld [vmem:[%s2003_s0 + $0x48] sm:$0xff]  ;;  %v1285_v10 = vld [vmem:[%s2003_s0 + $0x58] sm:$0xff]  ;;  %v1290_v11 = vld [vmem:[%s2003_s0 + $0x20] sm:$0xff]  ;;  %1005 = vmatprep.subr.mxu0 %v2009_v26  ;;  %1112 = vmatprep.subr.mxu1 %v2009_v26  ;;  %v1545_v60 = vshrl.u32 %v178_v56, 7 }
   0x4   :  { %v21_v9 = vld [vmem:[%s2003_s0 + $0x8] sm:$0xff]  ;;  %v1302_v13 = vld [vmem:[%s2003_s0 + $0x30] sm:$0xff]  ;;  %v1309_v14 = vld [vmem:[%s2003_s0 + $0x78] sm:$0xff]  ;;  %1037 = vmatprep.mubr.msk.f32.mxu0 %vm1201_vm0, %v2009_v26  ;;  %1076 = vmatprep.mubr.msk.f32.mxu1 %vm1201_vm0, %v2009_v26 }
   0x5   :  { %v1297_v12 = vld [vmem:[%s2003_s0 + $0x68] sm:$0xff]  ;;  %v1314_v15 = vld [vmem:[%s2003_s0 + $0x40] sm:$0xff]  ;;  %v1326_v17 = vld [vmem:[%s2003_s0 + $0x50] sm:$0xff]  ;;  %v180_v63 = vsub.s32 0, %v1545_v60 }
   0x6   :  { %70 = vperm.xlu1 %1150, %v1249_v4   ;;  %467 = vperm.xlu0 %1152, %v1254_v5   ;;  %v1321_v16 = vld [vmem:[%s2003_s0 + $0x88] sm:$0xff]  ;;  %v1333_v18 = vld [vmem:[%s2003_s0 + $0x98] sm:$0xff]  ;;  %v1338_v19 = vld [vmem:[%s2003_s0 + $0x60] sm:$0xff] }
   0x7   :  { %v1345_v20 = vld [vmem:[%s2003_s0 + $0x70] sm:$0xff]  ;;  %v1353_v22 = vld [vmem:[%s2003_s0 + $0x80] sm:$0xff]  ;;  %v1368_v24 = vld [vmem:[%s2003_s0 + $0xb8] sm:$0xff] }
   0x8   :  { %v1359_v23 = vld [vmem:[%s2003_s0 + $0x90] sm:$0xff]  ;;  %v734_v27 = vld [vmem:[%s2004_s3 + $0x78] sm:$0xff]  ;;  %v732_v29 = vld [vmem:[%s2004_s3 + $0x68] sm:$0xff] }
   0x9   :  { %1006 = vmatpush3.msra.mxu0 %v734_v27  ;;  %v733_v28 = vld [vmem:[%s2004_s3 + $0x70] sm:$0xff]  ;;  %1128 = vmatpush3.msra.mxu1 %v734_v27  ;;  %v731_v30 = vld [vmem:[%s2004_s3 + $0x60] sm:$0xff]  ;;  %v730_v31 = vld [vmem:[%s2004_s3 + $0x58] sm:$0xff] }
   0xa   :  { %80 = vperm.xlu1 %1150, %v1261_v6   ;;  %423 = vperm.xlu0 %1152, %v1266_v7   ;;  %v729_v32 = vld [vmem:[%s2004_s3 + $0x50] sm:$0xff]  ;;  %v728_v33 = vld [vmem:[%s2004_s3 + $0x48] sm:$0xff]  ;;  %v727_v34 = vld [vmem:[%s2004_s3 + $0x40] sm:$0xff] }
   0xb   :  { %1007 = vmatprep.subr.mxu0 %v2009_v26  ;;  %1113 = vmatprep.subr.mxu1 %v2009_v26  ;;  %v1430_v35 = vld [vmem:[%s2003_s0 + $0xb0] sm:$0xff]  ;;  %v726_v36 = vld [vmem:[%s2004_s3 + $0x38] sm:$0xff]  ;;  %v724_v38 = vld [vmem:[%s2004_s3 + $0x28] sm:$0xff] }
   0xc   :  { %1008 = vmatpush3.msra.mxu0 %v733_v28  ;;  %1129 = vmatpush3.msra.mxu1 %v733_v28  ;;  %v725_v37 = vld [vmem:[%s2004_s3 + $0x30] sm:$0xff]  ;;  %v723_v39 = vld [vmem:[%s2004_s3 + $0x20] sm:$0xff]  ;;  %v722_v40 = vld [vmem:[%s2004_s3 + $0x18] sm:$0xff] }
   0xd   :  { %1009 = vmatprep.subr.mxu0 %v2009_v26  ;;  %1114 = vmatprep.subr.mxu1 %v2009_v26  ;;  %v721_v41 = vld [vmem:[%s2004_s3 + $0x10] sm:$0xff]  ;;  %v720_v42 = vld [vmem:[%s2004_s3 + $0x8] sm:$0xff]  ;;  %v719_v43 = vld [vmem:[%s2004_s3] sm:$0xff] }
   0xe   :  { %90 = vperm.xlu1 %1150, %v1273_v8   ;;  %1179 = vset.pattern.permute.xlu0 %v2013_v1  ;;  %v1541_v58 = vld [vmem:[%s2003_s0 + $0xc0] sm:$0xff] }
   0xf   :  { %55 = vperm.xlu0 %1179, %v1242_v3   ;;  %1010 = vmatpush3.msra.mxu0 %v732_v29 }
  0x10   :  { %1011 = vmatprep.subr.mxu0 %v2009_v26  ;;  %1130 = vmatpush3.msra.mxu1 %v732_v29 }
  0x11   :  { %1012 = vmatpush3.msra.mxu0 %v731_v30  ;;  %1115 = vmatprep.subr.mxu1 %v2009_v26 }
  0x12   :  { %100 = vperm.xlu1 %1150, %v1266_v7   ;;  %1013 = vmatprep.subr.mxu0 %v2009_v26 }
  0x13   :  { %60 = vperm.xlu0 %1179, %v21_v9   ;;  %1014 = vmatpush3.msra.mxu0 %v730_v31 }
  0x14   :  { %1015 = vmatprep.subr.mxu0 %v2009_v26  ;;  %1131 = vmatpush3.msra.mxu1 %v731_v30 }
  0x15   :  { %1016 = vmatpush3.msra.mxu0 %v729_v32  ;;  %1116 = vmatprep.subr.mxu1 %v2009_v26 }
  0x16   :  { %110 = vperm.xlu1 %1150, %v1285_v10   ;;  %1017 = vmatprep.subr.mxu0 %v2009_v26 }
  0x17   :  { %75 = vperm.xlu0 %1179, %v1290_v11   ;;  %1132 = vmatpush3.msra.mxu1 %v730_v31 }
  0x18   :  { %1018 = vmatpush3.msra.mxu0 %v728_v33  ;;  %1117 = vmatprep.subr.mxu1 %v2009_v26 }
  0x19   :  { %1019 = vmatprep.subr.mxu0 %v2009_v26  ;;  %1133 = vmatpush3.msra.mxu1 %v729_v32 }
  0x1a   :  { %120 = vperm.xlu1 %1150, %v1297_v12   ;;  %1020 = vmatpush3.msra.mxu0 %v727_v34 }
  0x1b   :  { %85 = vperm.xlu0 %1179, %v1302_v13   ;;  %1118 = vmatprep.subr.mxu1 %v2009_v26 }
  0x1c   :  { %1021 = vmatprep.subr.mxu0 %v2009_v26  ;;  %1134 = vmatpush3.msra.mxu1 %v728_v33 }
  0x1d   :  { %1022 = vmatpush3.msra.mxu0 %v726_v36  ;;  %1119 = vmatprep.subr.mxu1 %v2009_v26 }
  0x1e   :  { %130 = vperm.xlu1 %1150, %v1309_v14   ;;  %1023 = vmatprep.subr.mxu0 %v2009_v26 }
  0x1f   :  { %95 = vperm.xlu0 %1179, %v1314_v15   ;;  %1135 = vmatpush3.msra.mxu1 %v727_v34 }
  0x20   :  { %1024 = vmatpush3.msra.mxu0 %v725_v37  ;;  %1120 = vmatprep.subr.mxu1 %v2009_v26 }
  0x21   :  { %1025 = vmatprep.subr.mxu0 %v2009_v26  ;;  %1136 = vmatpush3.msra.mxu1 %v726_v36 }
  0x22   :  { %140 = vperm.xlu1 %1150, %v1321_v16   ;;  %1026 = vmatpush3.msra.mxu0 %v724_v38 }
  0x23   :  { %105 = vperm.xlu0 %1179, %v1326_v17   ;;  %1121 = vmatprep.subr.mxu1 %v2009_v26 }
  0x24   :  { %1027 = vmatprep.subr.mxu0 %v2009_v26  ;;  %1137 = vmatpush3.msra.mxu1 %v725_v37 }
  0x25   :  { %1028 = vmatpush3.msra.mxu0 %v723_v39  ;;  %1122 = vmatprep.subr.mxu1 %v2009_v26 }
  0x26   :  { %150 = vperm.xlu1 %1150, %v1333_v18   ;;  %1029 = vmatprep.subr.mxu0 %v2009_v26 }
  0x27   :  { %115 = vperm.xlu0 %1179, %v1338_v19   ;;  %1138 = vmatpush3.msra.mxu1 %v724_v38 }
  0x28   :  { %1030 = vmatpush3.msra.mxu0 %v722_v40  ;;  %1123 = vmatprep.subr.mxu1 %v2009_v26 }
  0x29   :  { %1031 = vmatprep.subr.mxu0 %v2009_v26  ;;  %1139 = vmatpush3.msra.mxu1 %v723_v39 }
  0x2a   :  { %1151 = vset.pattern.permute.xlu1 %v2016_v21  ;;  %1032 = vmatpush3.msra.mxu0 %v721_v41 }
  0x2b   :  { %125 = vperm.xlu0 %1179, %v1345_v20   ;;  %233 = vperm.xlu1 %1151, %v1242_v3  }
  0x2c   :  { %1124 = vmatprep.subr.mxu1 %v2009_v26  ;;  %1033 = vmatprep.subr.mxu0 %v2009_v26 }
  0x2d   :  { %1140 = vmatpush3.msra.mxu1 %v722_v40  ;;  %1034 = vmatpush3.msra.mxu0 %v720_v42 }
  0x2e   :  { %1125 = vmatprep.subr.mxu1 %v2009_v26  ;;  %1035 = vmatprep.subr.mxu0 %v2009_v26 }
  0x2f   :  { %135 = vperm.xlu0 %1179, %v1353_v22   ;;  %237 = vperm.xlu1 %1151, %v21_v9  }
  0x30   :  { %1141 = vmatpush3.msra.mxu1 %v721_v41  ;;  %1036 = vmatpush3.msra.mxu0 %v719_v43 }
  0x31   :  { %1126 = vmatprep.subr.mxu1 %v2009_v26 }
  0x32   :  { %1142 = vmatpush3.msra.mxu1 %v720_v42 }
  0x33   :  { %145 = vperm.xlu0 %1179, %v1359_v23   ;;  %285 = vperm.xlu1 %1151, %v1297_v12  }
  0x34   :  { %1127 = vmatprep.subr.mxu1 %v2009_v26 }
  0x35   :  { %1143 = vmatpush3.msra.mxu1 %v719_v43 }
  0x37   :  { %155 = vperm.xlu0 %1179, %v1254_v5   ;;  %1153 = vset.pattern.permute.xlu1 %v2014_v0 }
  0x38   :  { %391 = vperm.xlu1 %1153, %v21_v9  }
  0x3b   :  { %170 = vperm.xlu0 %1179, %v1368_v24  }
  0x3c   :  { %439 = vperm.xlu1 %1153, %v1297_v12  }
  0x3f   :  { %1183 = vset.pattern.permute.xlu0 %v2016_v21 }
  0x40   :  { %241 = vperm.xlu0 %1183, %v1237_v2   ;;  %1154 = vset.pattern.permute.xlu1 %v2016_v21 }
  0x41   :  { %289 = vperm.xlu1 %1154, %v1345_v20  }
  0x44   :  { %245 = vperm.xlu0 %1183, %v1249_v4  }
  0x45   :  { %1155 = vset.pattern.permute.xlu1 %v2011_v25 }
  0x46   :  { %545 = vperm.xlu1 %1155, %v21_v9   ;;  %v488_v9 = vsub.s32 2, %v1545_v60 }
  0x48   :  { %249 = vperm.xlu0 %1183, %v1290_v11  }
  0x4a   :  { %1156 = vset.pattern.permute.xlu1 %v2014_v0 }
  0x4b   :  { %395 = vperm.xlu1 %1156, %v1237_v2  }
  0x4c   :  { %253 = vperm.xlu0 %1183, %v1261_v6  }
  0x4f   :  { %443 = vperm.xlu1 %1156, %v1345_v20  }
  0x50   :  { %257 = vperm.xlu0 %1183, %v1302_v13  }
  0x53   :  { %1157 = vset.pattern.permute.xlu1 %v2016_v21 }
  0x54   :  { %261 = vperm.xlu0 %1183, %v1273_v8   ;;  %293 = vperm.xlu1 %1157, %v1309_v14  }
  0x58   :  { %265 = vperm.xlu0 %1183, %v1314_v15   ;;  %1158 = vset.pattern.permute.xlu1 %v2011_v25 }
  0x59   :  { %549 = vperm.xlu1 %1158, %v1237_v2   ;;  %v1558_v2 = vld [vmem:[%s2005_s1] sm:$0xf] }
  0x5c   :  { %321 = vperm.xlu0 %1183, %v1430_v35  }
  0x5d   :  { %1159 = vset.pattern.permute.xlu1 %v2014_v0 }
  0x5e   :  { %399 = vperm.xlu1 %1159, %v1249_v4  }
  0x60   :  { %277 = vperm.xlu0 %1183, %v1285_v10  }
  0x62   :  { %447 = vperm.xlu1 %1159, %v1309_v14  }
  0x64   :  { %1185 = vset.pattern.permute.xlu0 %v2011_v25 }
  0x65   :  { %541 = vperm.xlu0 %1185, %v1242_v3  }
  0x66   :  { %1160 = vset.pattern.permute.xlu1 %v2016_v21 }
  0x67   :  { %297 = vperm.xlu1 %1160, %v1353_v22  }
  0x69   :  { %593 = vperm.xlu0 %1185, %v1297_v12  }
  0x6b   :  { %1161 = vset.pattern.permute.xlu1 %v2011_v25 }
  0x6c   :  { %553 = vperm.xlu1 %1161, %v1249_v4  }
  0x6d   :  { %597 = vperm.xlu0 %1185, %v1345_v20   ;;  %v1577_v20 = vrot.slane %v1558_v2, %v488_v9 }
  0x70   :  { %1162 = vset.pattern.permute.xlu1 %v2014_v0 }
  0x71   :  { %601 = vperm.xlu0 %1185, %v1309_v14   ;;  %403 = vperm.xlu1 %1162, %v1290_v11  }
  0x75   :  { %451 = vperm.xlu1 %1162, %v1353_v22   ;;  %605 = vperm.xlu0 %1185, %v1353_v22  }
  0x79   :  { %1163 = vset.pattern.permute.xlu1 %v2016_v21  ;;  %609 = vperm.xlu0 %1185, %v1321_v16  }
  0x7a   :  { %301 = vperm.xlu1 %1163, %v1321_v16  }
  0x7d   :  { %v1500_v44 = vpop.permute.xlu1 %65  ;;  %v388_v45 = vpop.permute.xlu0 %387  ;;  %613 = vperm.xlu0 %1185, %v1359_v23  }
  0x7e   :  { %1164 = vset.pattern.permute.xlu1 %v2011_v25  ;;  %v490_v30 = vmul.f32 %v1577_v20, %v388_v45 }
  0x7f   :  { %557 = vperm.xlu1 %1164, %v1290_v11   ;;  %v334_v11 = vsub.s32 1, %v1545_v60 }
  0x81   :  { %v1505_v46 = vpop.permute.xlu1 %70  ;;  %v1507_v47 = vpop.permute.xlu0 %467  ;;  %617 = vperm.xlu0 %1185, %v1333_v18   ;;  %v1580_v22 = vrot.slane %v1558_v2, %v334_v11 }
  0x83   :  { %1165 = vset.pattern.permute.xlu1 %v2014_v0 }
  0x84   :  { %407 = vperm.xlu1 %1165, %v1261_v6  }
  0x85   :  { %v1512_v48 = vpop.permute.xlu1 %80  ;;  %v1514_v49 = vpop.permute.xlu0 %423  ;;  %573 = vperm.xlu0 %1185, %v1314_v15  }
  0x88   :  { %455 = vperm.xlu1 %1165, %v1321_v16  }
  0x89   :  { %v1518_v50 = vpop.permute.xlu1 %90  ;;  %629 = vperm.xlu0 %1185, %v1430_v35  }
  0x8a   :  { %v56_v51 = vpop.permute.xlu0 %55 }
  0x8c   :  { %1166 = vset.pattern.permute.xlu1 %v2016_v21 }
  0x8d   :  { %v1522_v52 = vpop.permute.xlu1 %100  ;;  %305 = vperm.xlu1 %1166, %v1359_v23   ;;  %585 = vperm.xlu0 %1185, %v1285_v10  }
  0x8e   :  { %v1526_v53 = vpop.permute.xlu0 %60 }
  0x91   :  { %v1528_v54 = vpop.permute.xlu1 %110  ;;  %1167 = vset.pattern.permute.xlu1 %v2011_v25  ;;  %1191 = vset.pattern.permute.xlu0 %v2014_v0 }
  0x92   :  { %2018 = vst [vmem:[#allocation2_spill] sm:$0xff] %v1528_v54  ;;  %561 = vperm.xlu1 %1167, %v1261_v6   ;;  %v1533_v55 = vpop.permute.xlu0 %75  ;;  %479 = vperm.xlu0 %1191, %v1368_v24   ;;  %v1565_v6 = vrot.slane %v1558_v2, %v180_v63 }
  0x94   :  { %v182_v12 = vmul.f32 %v1565_v6, %v56_v51 }
  0x95   :  { %v1536_v57 = vpop.permute.xlu1 %120 }
  0x96   :  { %1168 = vset.pattern.permute.xlu1 %v2014_v0  ;;  %v86_v59 = vpop.permute.xlu0 %85  ;;  %483 = vperm.xlu0 %1191, %v1541_v58  }
  0x97   :  { %411 = vperm.xlu1 %1168, %v1302_v13  }
  0x99   :  { %v1548_v61 = vpop.permute.xlu1 %130 }
  0x9a   :  { %v1550_v62 = vpop.permute.xlu0 %95  ;;  %1195 = vset.pattern.permute.xlu0 %v2011_v25 }
  0x9b   :  { %459 = vperm.xlu1 %1168, %v1359_v23   ;;  %v1585_v23 = vld [vmem:[%s2006_s2] ss:$0 sm:$0xff] }
  0x9c   :  { %v207_v27 = vadd.f32 %v1585_v23, %v182_v12 }
  0x9d   :  { %v1560_v3 = vpop.permute.xlu1 %140 }
  0x9e   :  { %v1562_v4 = vpop.permute.xlu0 %105 }
  0x9f   :  { %2019 = vst [vmem:[#allocation3_spill] sm:$0xff] %v1562_v4  ;;  %1169 = vset.pattern.permute.xlu1 %v2016_v21 }
  0xa0   :  { %309 = vperm.xlu1 %1169, %v1333_v18  }
  0xa1   :  { %v1572_v14 = vpop.permute.xlu1 %150 }
  0xa2   :  { %v1574_v16 = vpop.permute.xlu0 %115 }
  0xa3   :  { %2020 = vst [vmem:[#allocation4_spill] sm:$0xff] %v1574_v16  ;;  %v2023_v16 = vmov 1  }
  0xa4   :  { %1170 = vset.pattern.permute.xlu1 %v2011_v25 }
  0xa5   :  { %565 = vperm.xlu1 %1170, %v1302_v13  }
  0xa6   :  { %v234_v28 = vpop.permute.xlu1 %233  ;;  %v1590_v29 = vpop.permute.xlu0 %125 }
  0xa7   :  { %v336_v31 = vmul.f32 %v1580_v22, %v234_v28 }
  0xa9   :  { %v361_v32 = vadd.f32 %v336_v31, %v207_v27  ;;  %1171 = vset.pattern.permute.xlu1 %v2014_v0 }
  0xaa   :  { %415 = vperm.xlu1 %1171, %v1273_v8   ;;  %v238_v33 = vpop.permute.xlu1 %237  ;;  %v1596_v34 = vpop.permute.xlu0 %135 }
  0xab   :  { %v1598_v36 = vadd.f32 %v490_v30, %v361_v32 }
  0xae   :  { %463 = vperm.xlu1 %1171, %v1333_v18   ;;  %v286_v13 = vpop.permute.xlu1 %285  ;;  %v1601_v37 = vpop.permute.xlu0 %145  ;;  %v1614_v18 = vld [vmem:[%s2003_s0 + $0xa8] sm:$0xff] }
  0xb2   :  { %1172 = vset.pattern.permute.xlu1 %v2016_v21  ;;  %v1604_v38 = vpop.permute.xlu0 %155 }
  0xb3   :  { %313 = vperm.xlu1 %1172, %v1254_v5   ;;  %v392_v39 = vpop.permute.xlu1 %391 }
  0xb6   :  { %v1607_v40 = vpop.permute.xlu0 %170 }
  0xb7   :  { %2021 = vst [vmem:[#allocation5_spill] sm:$0xff] %v1607_v40  ;;  %1173 = vset.pattern.permute.xlu1 %v2011_v25  ;;  %v440_v41 = vpop.permute.xlu1 %439 }
  0xb8   :  { %569 = vperm.xlu1 %1173, %v1273_v8   ;;  %v188_v8 = vmul.f32 %v1565_v6, %v86_v59 }
  0xba   :  { %v213_v11 = vadd.f32 %v1585_v23, %v188_v8 }
  0xbb   :  { %v242_v42 = vpop.permute.xlu0 %241 }
  0xbc   :  { %1174 = vset.pattern.permute.xlu1 %v2013_v1  ;;  %v290_v43 = vpop.permute.xlu1 %289 }
  0xbd   :  { %160 = vperm.xlu1 %1174, %v1614_v18  }
  0xbf   :  { %v1618_v45 = vpop.permute.xlu0 %245 }
  0xc1   :  { %1175 = vset.pattern.permute.xlu1 %v2014_v0  ;;  %v546_v51 = vpop.permute.xlu1 %545 }
  0xc2   :  { %419 = vperm.xlu1 %1175, %v1314_v15   ;;  %v190_v15 = vmul.f32 %v1565_v6, %v1550_v62 }
  0xc3   :  { %v1622_v56 = vpop.permute.xlu0 %249 }
  0xc4   :  { %v215_v32 = vadd.f32 %v1585_v23, %v190_v15 }
  0xc6   :  { %1176 = vset.pattern.permute.xlu1 %v2016_v21  ;;  %v396_v63 = vpop.permute.xlu1 %395  ;;  %v491_v21 = vmul.f32 %v1577_v20, %v392_v39  ;;  %v197_v39 = vmul.f32 %v1565_v6, %v1548_v61  ;;  %v339_v61 = vmul.f32 %v1580_v22, %v1618_v45 }
  0xc7   :  { %v1626_v9 = vpop.permute.xlu0 %253  ;;  %269 = vperm.xlu1 %1176, %v1266_v7  }
  0xca   :  { %v444_v12 = vpop.permute.xlu1 %443 }
  0xcb   :  { %v258_v27 = vpop.permute.xlu0 %257  ;;  %317 = vperm.xlu1 %1176, %v1614_v18  }
  0xcc   :  { %v342_v28 = vmul.f32 %v1580_v22, %v258_v27 }
  0xce   :  { %v1634_v30 = vadd.f32 %v342_v28, %v213_v11  ;;  %v183_v28 = vmul.f32 %v1565_v6, %v1526_v53  ;;  %v195_v53 = vmul.f32 %v1565_v6, %v1536_v57 }
  0xcf   :  { %v1636_v59 = vpop.permute.xlu0 %261  ;;  %1177 = vset.pattern.permute.xlu1 %v2011_v25  ;;  %v294_v31 = vpop.permute.xlu1 %293  ;;  %v642_v25 = vsub.s32 3, %v1545_v60 }
  0xd0   :  { %621 = vperm.xlu1 %1177, %v1254_v5   ;;  %v351_v45 = vmul.f32 %v1580_v22, %v294_v31 }
  0xd3   :  { %v266_v8 = vpop.permute.xlu0 %265 }
  0xd4   :  { %v344_v26 = vmul.f32 %v1580_v22, %v266_v8  ;;  %1178 = vset.pattern.permute.xlu1 %v2013_v1  ;;  %v550_v27 = vpop.permute.xlu1 %549  ;;  %v184_v8 = vmul.f32 %v1565_v6, %v1500_v44  ;;  %v1660_v1 = vrot.slane %v1558_v2, %v642_v25  ;;  %v349_v44 = vmul.f32 %v1580_v22, %v286_v13 }
  0xd5   :  { %165 = vperm.xlu1 %1178, %v1430_v35   ;;  %v185_v2 = vmul.f32 %v1565_v6, %v1505_v46  ;;  %v503_v13 = vmul.f32 %v1577_v20, %v440_v41  ;;  %v492_v46 = vmul.f32 %v1577_v20, %v396_v63 }
  0xd6   :  { %v1644_v62 = vadd.f32 %v344_v26, %v215_v32  ;;  %v208_v26 = vadd.f32 %v1585_v23, %v183_v28  ;;  %v337_v32 = vmul.f32 %v1580_v22, %v238_v33  ;;  %v338_v28 = vmul.f32 %v1580_v22, %v242_v42 }
  0xd7   :  { %v1646_v11 = vpop.permute.xlu0 %321  ;;  %v209_v25 = vadd.f32 %v1585_v23, %v184_v8  ;;  %v645_v33 = vmul.f32 %v1660_v1, %v546_v51  ;;  %v350_v8 = vmul.f32 %v1580_v22, %v290_v43 }
  0xd8   :  { %v362_v57 = vadd.f32 %v337_v32, %v208_v26 }
  0xd9   :  { %1180 = vset.pattern.permute.xlu1 %v2014_v0  ;;  %v400_v5 = vpop.permute.xlu1 %399  ;;  %v196_v0 = vmul.f32 %v1565_v6, %v1590_v29  ;;  %v220_v29 = vadd.f32 %v1585_v23, %v195_v53  ;;  %v363_v51 = vadd.f32 %v338_v28, %v209_v25  ;;  %v2024_v53 = vmov 3  }
  0xda   :  { %471 = vperm.xlu1 %1180, %v1614_v18   ;;  %v516_v54 = vadd.f32 %v491_v21, %v362_v57  ;;  %v210_v28 = vadd.f32 %v1585_v23, %v185_v2  ;;  %v2025_v2 = vmov 0.0  }
  0xdb   :  { %v1653_v15 = vpop.permute.xlu0 %277  ;;  %v374_v32 = vadd.f32 %v349_v44, %v220_v29  ;;  %v517_v57 = vadd.f32 %v492_v46, %v363_v51 }
  0xdc   :  { %2022 = vst [vmem:[#allocation6_spill] sm:$0xff] %v1653_v15  ;;  %v221_v15 = vadd.f32 %v1585_v23, %v196_v0  ;;  %v670_v41 = vadd.f32 %v645_v33, %v516_v54  ;;  %v646_v0 = vmul.f32 %v1660_v1, %v550_v27  ;;  %v198_v54 = vmul.f32 %v1565_v6, %v1596_v34 }
  0xdd   :  { %v448_v60 = vpop.permute.xlu1 %447  ;;  %v528_v43 = vadd.f32 %v503_v13, %v374_v32  ;;  %v364_v33 = vadd.f32 %v339_v61, %v210_v28 }
  0xde   :  { %1181 = vset.pattern.permute.xlu1 %v2023_v16  ;;  %v375_v25 = vadd.f32 %v350_v8, %v221_v15  ;;  %v671_v13 = vadd.f32 %v646_v0, %v517_v57  ;;  %v505_v15 = vmul.f32 %v1577_v20, %v448_v60  ;;  %v223_v32 = vadd.f32 %v1585_v23, %v198_v54 }
  0xdf   :  { %273 = vperm.xlu1 %1181, %v1326_v17  }
  0xe0   :  { %v542_v40 = vpop.permute.xlu0 %541  ;;  %v696_v51 = vmax.f32 %v671_v13, 0.0 }
  0xe1   :  { %v644_v42 = vmul.f32 %v1660_v1, %v542_v40  ;;  %v504_v40 = vmul.f32 %v1577_v20, %v444_v12  ;;  %v493_v12 = vmul.f32 %v1577_v20, %v400_v5 }
  0xe2   :  { %v298_v26 = vpop.permute.xlu1 %297 }
  0xe3   :  { %v669_v4 = vadd.f32 %v644_v42, %v1598_v36  ;;  %1182 = vset.pattern.permute.xlu1 %v2024_v53  ;;  %v222_v36 = vadd.f32 %v1585_v23, %v197_v39  ;;  %v529_v29 = vadd.f32 %v504_v40, %v375_v25  ;;  %v518_v8 = vadd.f32 %v493_v12, %v364_v33 }
  0xe4   :  { %v594_v21 = vpop.permute.xlu0 %593  ;;  %577 = vperm.xlu1 %1182, %v1266_v7   ;;  %v340_v12 = vmul.f32 %v1580_v22, %v1622_v56 }
  0xe5   :  { %v694_v63 = vmax.f32 %v669_v4, 0.0  ;;  %v657_v44 = vmul.f32 %v1660_v1, %v594_v21  ;;  %v695_v4 = vmax.f32 %v670_v41, 0.0  ;;  %v376_v39 = vadd.f32 %v351_v45, %v222_v36 }
  0xe6   :  { %v2026_v41 = vmov 2  }
  0xe7   :  { %v682_v27 = vadd.f32 %v657_v44, %v528_v43  ;;  %1038 = vmatmul.mubr.f32.vlgmr.msra.gmra.mxu0 %v694_v63  ;;  %v554_v7 = vpop.permute.xlu1 %553  ;;  %v530_v60 = vadd.f32 %v505_v15, %v376_v39 }
  0xe8   :  { %v598_v42 = vpop.permute.xlu0 %597  ;;  %625 = vperm.xlu1 %1182, %v1614_v18   ;;  %1040 = vmatprep.mubr.msk.f32.mxu0 %vm1201_vm0, %v2025_v2  ;;  %v647_v31 = vmul.f32 %v1660_v1, %v554_v7  ;;  %v352_v18 = vmul.f32 %v1580_v22, %v298_v26  ;;  %v186_v26 = vmul.f32 %v1565_v6, %v1533_v55 }
  0xe9   :  { %v707_v34 = vmax.f32 %v682_v27, 0.0  ;;  %v658_v5 = vmul.f32 %v1660_v1, %v598_v42 }
  0xea   :  { %v672_v0 = vadd.f32 %v647_v31, %v518_v8  ;;  %v377_v44 = vadd.f32 %v352_v18, %v223_v32  ;;  %v211_v45 = vadd.f32 %v1585_v23, %v186_v26 }
  0xeb   :  { %v683_v46 = vadd.f32 %v658_v5, %v529_v29  ;;  %1041 = vmatmul.mubr.f32.gmra.mxu0 %v695_v4  ;;  %1077 = vmatmul.mubr.f32.vlgmr.msra.gmra.mxu1 %v707_v34  ;;  %v199_v34 = vmul.f32 %v1565_v6, %v1560_v3  ;;  %v2027_v5 = vmov 0  }
  0xec   :  { %v602_v61 = vpop.permute.xlu0 %601  ;;  %1184 = vset.pattern.permute.xlu1 %v2026_v41  ;;  %v404_v40 = vpop.permute.xlu1 %403  ;;  %1043 = vmatprep.mubr.msk.f32.mxu0 %vm1201_vm0, %v2025_v2  ;;  %v697_v25 = vmax.f32 %v672_v0, 0.0  ;;  %v365_v33 = vadd.f32 %v340_v12, %v211_v45 }
  0xed   :  { %v708_v21 = vmax.f32 %v683_v46, 0.0  ;;  %v659_v43 = vmul.f32 %v1660_v1, %v602_v61  ;;  %427 = vperm.xlu1 %1184, %v1326_v17   ;;  %1079 = vmatprep.mubr.msk.f32.mxu1 %vm1201_vm0, %v2025_v2  ;;  %v494_v4 = vmul.f32 %v1577_v20, %v404_v40  ;;  %v224_v32 = vadd.f32 %v1585_v23, %v199_v34 }
  0xee   :  { %v187_v61 = vmul.f32 %v1565_v6, %v1512_v48 }
  0xef   :  { %v684_v63 = vadd.f32 %v659_v43, %v530_v60  ;;  %1044 = vmatmul.mubr.f32.gmra.mxu0 %v696_v51  ;;  %1080 = vmatmul.mubr.f32.gmra.mxu1 %v708_v21  ;;  %v519_v13 = vadd.f32 %v494_v4, %v365_v33  ;;  %v341_v60 = vmul.f32 %v1580_v22, %v1626_v9 }
  0xf0   :  { %v452_v28 = vpop.permute.xlu1 %451  ;;  %v606_v36 = vpop.permute.xlu0 %605  ;;  %1046 = vmatprep.mubr.msk.f32.mxu0 %vm1201_vm0, %v2025_v2  ;;  %1082 = vmatprep.mubr.msk.f32.mxu1 %vm1201_vm0, %v2025_v2  ;;  %v212_v43 = vadd.f32 %v1585_v23, %v187_v61 }
  0xf1   :  { %v709_v57 = vmax.f32 %v684_v63, 0.0  ;;  %v506_v54 = vmul.f32 %v1577_v20, %v452_v28  ;;  %475 = vperm.xlu1 %1184, %v1430_v35   ;;  %v660_v55 = vmul.f32 %v1660_v1, %v606_v36 }
  0xf3   :  { %v531_v27 = vadd.f32 %v506_v54, %v377_v44  ;;  %1047 = vmatmul.mubr.f32.gmra.mxu0 %v697_v25  ;;  %1083 = vmatmul.mubr.f32.gmra.mxu1 %v709_v57  ;;  %v366_v44 = vadd.f32 %v341_v60, %v212_v43 }
  0xf4   :  { %1085 = vmatprep.mubr.msk.f32.mxu1 %vm1201_vm0, %v2025_v2  ;;  %1049 = vmatprep.mubr.msk.f32.mxu0 %vm1201_vm0, %v2025_v2  ;;  %v610_v46 = vpop.permute.xlu0 %609 }
  0xf5   :  { %v685_v7 = vadd.f32 %v660_v55, %v531_v27  ;;  %1186 = vset.pattern.permute.xlu1 %v2023_v16  ;;  %v302_v35 = vpop.permute.xlu1 %301  ;;  %v661_v3 = vmul.f32 %v1660_v1, %v610_v46 }
  0xf6   :  { %325 = vperm.xlu1 %1186, %v1368_v24   ;;  %v353_v8 = vmul.f32 %v1580_v22, %v302_v35 }
  0xf7   :  { %v710_v29 = vmax.f32 %v685_v7, 0.0 }
  0xf8   :  { %v378_v51 = vadd.f32 %v353_v8, %v224_v32  ;;  %v614_v55 = vpop.permute.xlu0 %613  ;;  %v189_v8 = vmul.f32 %v1565_v6, %v1518_v50  ;;  %v343_v32 = vmul.f32 %v1580_v22, %v1636_v59 }
  0xf9   :  { %1086 = vmatmul.mubr.f32.gmra.mxu1 %v710_v29  ;;  %v662_v27 = vmul.f32 %v1660_v1, %v614_v55 }
  0xfa   :  { %1187 = vset.pattern.permute.xlu1 %v2024_v53  ;;  %v558_v56 = vpop.permute.xlu1 %557  ;;  %1088 = vmatprep.mubr.msk.f32.mxu1 %vm1201_vm0, %v2025_v2  ;;  %v214_v61 = vadd.f32 %v1585_v23, %v189_v8 }
  0xfb   :  { %v648_v42 = vmul.f32 %v1660_v1, %v558_v56  ;;  %581 = vperm.xlu1 %1187, %v1326_v17  }
  0xfc   :  { %v368_v50 = vadd.f32 %v343_v32, %v214_v61  ;;  %v358_v32 = vmul.f32 %v1580_v22, %v1646_v11  ;;  %v2028_v61 = vld [vmem:[#allocation3_spill] sm:$0xff] }
  0xfd   :  { %v673_v15 = vadd.f32 %v648_v42, %v519_v13 }
  0xff   :  { %v698_v31 = vmax.f32 %v673_v15, 0.0  ;;  %1188 = vset.pattern.permute.xlu1 %v2027_v5  ;;  %v408_v39 = vpop.permute.xlu1 %407 }
 0x100   :  { %175 = vperm.xlu1 %1188, %v1541_v58   ;;  %v495_v26 = vmul.f32 %v1577_v20, %v408_v39 }
 0x101   :  { %1050 = vmatmul.mubr.f32.gmra.mxu0 %v698_v31 }
 0x102   :  { %1052 = vmatprep.mubr.msk.f32.mxu0 %vm1201_vm0, %v2025_v2  ;;  %v520_v48 = vadd.f32 %v495_v26, %v366_v44 }
 0x103   :  { %v456_v17 = vpop.permute.xlu1 %455 }
 0x104   :  { %v507_v18 = vmul.f32 %v1577_v20, %v456_v17  ;;  %1189 = vset.pattern.permute.xlu1 %v2026_v41 }
 0x105   :  { %431 = vperm.xlu1 %1189, %v1285_v10  }
 0x106   :  { %v532_v40 = vadd.f32 %v507_v18, %v378_v51 }
 0x108   :  { %v686_v0 = vadd.f32 %v661_v3, %v532_v40  ;;  %v306_v21 = vpop.permute.xlu1 %305 }
 0x109   :  { %1190 = vset.pattern.permute.xlu1 %v2023_v16  ;;  %v200_v16 = vmul.f32 %v1565_v6, %v1601_v37  ;;  %v354_v54 = vmul.f32 %v1580_v22, %v306_v21 }
 0x10a   :  { %v711_v63 = vmax.f32 %v686_v0, 0.0  ;;  %281 = vperm.xlu1 %1190, %v1338_v19  }
 0x10b   :  { %v225_v57 = vadd.f32 %v1585_v23, %v200_v16 }
 0x10c   :  { %1089 = vmatmul.mubr.f32.gmra.mxu1 %v711_v63 }
 0x10d   :  { %v562_v10 = vpop.permute.xlu1 %561  ;;  %1091 = vmatprep.mubr.msk.f32.mxu1 %vm1201_vm0, %v2025_v2  ;;  %v379_v12 = vadd.f32 %v354_v54, %v225_v57 }
 0x10e   :  { %v649_v9 = vmul.f32 %v1660_v1, %v562_v10  ;;  %329 = vperm.xlu1 %1190, %v1541_v58  }
 0x110   :  { %v674_v28 = vadd.f32 %v649_v9, %v520_v48 }
 0x112   :  { %v699_v36 = vmax.f32 %v674_v28, 0.0  ;;  %1192 = vset.pattern.permute.xlu1 %v2024_v53  ;;  %v412_v25 = vpop.permute.xlu1 %411 }
 0x113   :  { %633 = vperm.xlu1 %1192, %v1368_v24   ;;  %v496_v24 = vmul.f32 %v1577_v20, %v412_v25 }
 0x114   :  { %1053 = vmatmul.mubr.f32.gmra.mxu0 %v699_v36 }
 0x115   :  { %1055 = vmatprep.mubr.msk.f32.mxu0 %vm1201_vm0, %v2025_v2 }
 0x116   :  { %v460_v45 = vpop.permute.xlu1 %459 }
 0x117   :  { %v508_v37 = vmul.f32 %v1577_v20, %v460_v45  ;;  %1193 = vset.pattern.permute.xlu1 %v2026_v41  ;;  %v521_v41 = vadd.f32 %v496_v24, %v1634_v30 }
 0x118   :  { %435 = vperm.xlu1 %1193, %v1338_v19  }
 0x119   :  { %v533_v7 = vadd.f32 %v508_v37, %v379_v12 }
 0x11b   :  { %v687_v35 = vadd.f32 %v662_v27, %v533_v7  ;;  %v310_v33 = vpop.permute.xlu1 %309 }
 0x11c   :  { %1194 = vset.pattern.permute.xlu1 %v2024_v53  ;;  %v201_v53 = vmul.f32 %v1565_v6, %v1572_v14  ;;  %v355_v34 = vmul.f32 %v1580_v22, %v310_v33  ;;  %v202_v14 = vmul.f32 %v1565_v6, %v1604_v38  ;;  %v510_v38 = vmul.f32 %v1577_v20, %v1507_v47 }
 0x11d   :  { %v712_v4 = vmax.f32 %v687_v35, 0.0  ;;  %589 = vperm.xlu1 %1194, %v1338_v19   ;;  %v618_v19 = vpop.permute.xlu0 %617 }
 0x11e   :  { %v226_v31 = vadd.f32 %v1585_v23, %v201_v53  ;;  %v227_v18 = vadd.f32 %v1585_v23, %v202_v14 }
 0x11f   :  { %1092 = vmatmul.mubr.f32.gmra.mxu1 %v712_v4 }
 0x120   :  { %v566_v29 = vpop.permute.xlu1 %565  ;;  %1094 = vmatprep.mubr.msk.f32.mxu1 %vm1201_vm0, %v2025_v2  ;;  %v380_v5 = vadd.f32 %v355_v34, %v226_v31 }
 0x121   :  { %v650_v56 = vmul.f32 %v1660_v1, %v566_v29  ;;  %637 = vperm.xlu1 %1194, %v1541_v58   ;;  %v663_v58 = vmul.f32 %v1660_v1, %v618_v19  ;;  %v574_v48 = vpop.permute.xlu0 %573 }
 0x122   :  { %v652_v16 = vmul.f32 %v1660_v1, %v574_v48 }
 0x123   :  { %v675_v13 = vadd.f32 %v650_v56, %v521_v41  ;;  %v499_v41 = vmul.f32 %v1577_v20, %v1514_v49 }
 0x125   :  { %v700_v42 = vmax.f32 %v675_v13, 0.0  ;;  %v416_v15 = vpop.permute.xlu1 %415 }
 0x126   :  { %v497_v40 = vmul.f32 %v1577_v20, %v416_v15 }
 0x127   :  { %1056 = vmatmul.mubr.f32.gmra.mxu0 %v700_v42 }
 0x128   :  { %1058 = vmatprep.mubr.msk.f32.mxu0 %vm1201_vm0, %v2025_v2  ;;  %v522_v59 = vadd.f32 %v497_v40, %v368_v50  ;;  %v192_v40 = vmul.f32 %v1565_v6, %v2028_v61 }
 0x129   :  { %v464_v30 = vpop.permute.xlu1 %463 }
 0x12a   :  { %v509_v39 = vmul.f32 %v1577_v20, %v464_v30  ;;  %v217_v11 = vadd.f32 %v1585_v23, %v192_v40 }
 0x12c   :  { %v534_v46 = vadd.f32 %v509_v39, %v380_v5 }
 0x12e   :  { %v688_v17 = vadd.f32 %v663_v58, %v534_v46  ;;  %v314_v51 = vpop.permute.xlu1 %313 }
 0x12f   :  { %v356_v3 = vmul.f32 %v1580_v22, %v314_v51 }
 0x130   :  { %v713_v60 = vmax.f32 %v688_v17, 0.0 }
 0x131   :  { %v381_v0 = vadd.f32 %v356_v3, %v227_v18  ;;  %v630_v3 = vpop.permute.xlu0 %629 }
 0x132   :  { %1095 = vmatmul.mubr.f32.gmra.mxu1 %v713_v60  ;;  %v666_v60 = vmul.f32 %v1660_v1, %v630_v3 }
 0x133   :  { %v570_v21 = vpop.permute.xlu1 %569  ;;  %v535_v43 = vadd.f32 %v510_v38, %v381_v0  ;;  %1097 = vmatprep.mubr.msk.f32.mxu1 %vm1201_vm0, %v2025_v2 }
 0x134   :  { %v651_v26 = vmul.f32 %v1660_v1, %v570_v21 }
 0x136   :  { %v676_v63 = vadd.f32 %v651_v26, %v522_v59 }
 0x138   :  { %v701_v44 = vmax.f32 %v676_v63, 0.0  ;;  %v161_v10 = vpop.permute.xlu1 %160 }
 0x139   :  { %v203_v4 = vmul.f32 %v1565_v6, %v161_v10 }
 0x13a   :  { %1059 = vmatmul.mubr.f32.gmra.mxu0 %v701_v44 }
 0x13b   :  { %1061 = vmatprep.mubr.msk.f32.mxu0 %vm1201_vm0, %v2025_v2  ;;  %v228_v53 = vadd.f32 %v1585_v23, %v203_v4 }
 0x13d   :  { %v420_v47 = vpop.permute.xlu1 %419 }
 0x13e   :  { %v498_v9 = vmul.f32 %v1577_v20, %v420_v47  ;;  %v2029_v47 = vld [vmem:[#allocation2_spill] sm:$0xff] }
 0x140   :  { %v523_v28 = vadd.f32 %v498_v9, %v1644_v62  ;;  %v191_v62 = vmul.f32 %v1565_v6, %v1522_v52  ;;  %v193_v9 = vmul.f32 %v1565_v6, %v2029_v47 }
 0x142   :  { %v677_v36 = vadd.f32 %v652_v16, %v523_v28  ;;  %v270_v25 = vpop.permute.xlu1 %269  ;;  %v216_v33 = vadd.f32 %v1585_v23, %v191_v62 }
 0x143   :  { %v345_v35 = vmul.f32 %v1580_v22, %v270_v25 }
 0x144   :  { %v702_v57 = vmax.f32 %v677_v36, 0.0  ;;  %v2030_v36 = vld [vmem:[#allocation6_spill] sm:$0xff] }
 0x145   :  { %v370_v29 = vadd.f32 %v345_v35, %v216_v33  ;;  %v347_v25 = vmul.f32 %v1580_v22, %v2030_v36 }
 0x146   :  { %1062 = vmatmul.mubr.f32.gmra.mxu0 %v702_v57  ;;  %v318_v54 = vpop.permute.xlu1 %317  ;;  %v218_v57 = vadd.f32 %v1585_v23, %v193_v9 }
 0x147   :  { %1064 = vmatprep.mubr.msk.f32.mxu0 %vm1201_vm0, %v2025_v2  ;;  %v357_v56 = vmul.f32 %v1580_v22, %v318_v54  ;;  %v524_v15 = vadd.f32 %v499_v41, %v370_v29  ;;  %v586_v54 = vpop.permute.xlu0 %585 }
 0x149   :  { %v382_v34 = vadd.f32 %v357_v56, %v228_v53 }
 0x14b   :  { %v622_v55 = vpop.permute.xlu1 %621  ;;  %v480_v29 = vpop.permute.xlu0 %479 }
 0x14c   :  { %v664_v45 = vmul.f32 %v1660_v1, %v622_v55  ;;  %v513_v53 = vmul.f32 %v1577_v20, %v480_v29 }
 0x14e   :  { %v689_v12 = vadd.f32 %v664_v45, %v535_v43  ;;  %v372_v45 = vadd.f32 %v347_v25, %v218_v57 }
 0x150   :  { %v714_v37 = vmax.f32 %v689_v12, 0.0  ;;  %v166_v27 = vpop.permute.xlu1 %165 }
 0x151   :  { %v204_v58 = vmul.f32 %v1565_v6, %v166_v27 }
 0x152   :  { %1098 = vmatmul.mubr.f32.gmra.mxu1 %v714_v37  ;;  %v655_v37 = vmul.f32 %v1660_v1, %v586_v54 }
 0x153   :  { %1100 = vmatprep.mubr.msk.f32.mxu1 %vm1201_vm0, %v2025_v2  ;;  %v229_v46 = vadd.f32 %v1585_v23, %v204_v58 }
 0x155   :  { %v472_v7 = vpop.permute.xlu1 %471  ;;  %v383_v51 = vadd.f32 %v358_v32, %v229_v46  ;;  %v484_v46 = vpop.permute.xlu0 %483 }
 0x156   :  { %v511_v42 = vmul.f32 %v1577_v20, %v472_v7  ;;  %v2031_v7 = vld [vmem:[#allocation5_spill] sm:$0xff] }
 0x157   :  { %v205_v62 = vmul.f32 %v1565_v6, %v2031_v7 }
 0x158   :  { %v536_v30 = vadd.f32 %v511_v42, %v382_v34  ;;  %v2032_v34 = vld [vmem:[#allocation4_spill] sm:$0xff] }
 0x159   :  { %v230_v41 = vadd.f32 %v1585_v23, %v205_v62 }
 0x15a   :  { %v274_v24 = vpop.permute.xlu1 %273 }
 0x15b   :  { %v346_v0 = vmul.f32 %v1580_v22, %v274_v24 }
 0x15d   :  { %v371_v26 = vadd.f32 %v346_v0, %v217_v11 }
 0x15f   :  { %v578_v13 = vpop.permute.xlu1 %577 }
 0x160   :  { %v653_v52 = vmul.f32 %v1660_v1, %v578_v13 }
 0x162   :  { %v678_v19 = vadd.f32 %v653_v52, %v524_v15 }
 0x163   :  { %v626_v31 = vpop.permute.xlu1 %625 }
 0x164   :  { %v703_v5 = vmax.f32 %v678_v19, 0.0  ;;  %v665_v39 = vmul.f32 %v1660_v1, %v626_v31  ;;  %v194_v19 = vmul.f32 %v1565_v6, %v2032_v34 }
 0x166   :  { %v690_v49 = vadd.f32 %v665_v39, %v536_v30  ;;  %1065 = vmatmul.mubr.f32.gmra.mxu0 %v703_v5 }
 0x167   :  { %1067 = vmatprep.mubr.msk.f32.mxu0 %vm1201_vm0, %v2025_v2 }
 0x168   :  { %v715_v14 = vmax.f32 %v690_v49, 0.0  ;;  %v428_v8 = vpop.permute.xlu1 %427  ;;  %v219_v49 = vadd.f32 %v1585_v23, %v194_v19 }
 0x169   :  { %v500_v43 = vmul.f32 %v1577_v20, %v428_v8 }
 0x16a   :  { %1101 = vmatmul.mubr.f32.gmra.mxu1 %v715_v14 }
 0x16b   :  { %1103 = vmatprep.mubr.msk.f32.mxu1 %vm1201_vm0, %v2025_v2  ;;  %v525_v44 = vadd.f32 %v500_v43, %v371_v26 }
 0x16c   :  { %v476_v17 = vpop.permute.xlu1 %475 }
 0x16d   :  { %v512_v18 = vmul.f32 %v1577_v20, %v476_v17 }
 0x16f   :  { %v537_v38 = vadd.f32 %v512_v18, %v383_v51  ;;  %v514_v18 = vmul.f32 %v1577_v20, %v484_v46 }
 0x171   :  { %v326_v50 = vpop.permute.xlu1 %325  ;;  %v691_v21 = vadd.f32 %v666_v60, %v537_v38 }
 0x172   :  { %v359_v24 = vmul.f32 %v1580_v22, %v326_v50 }
 0x173   :  { %v716_v59 = vmax.f32 %v691_v21, 0.0 }
 0x174   :  { %v384_v13 = vadd.f32 %v359_v24, %v230_v41 }
 0x175   :  { %1104 = vmatmul.mubr.f32.gmra.mxu1 %v716_v59 }
 0x176   :  { %v582_v63 = vpop.permute.xlu1 %581  ;;  %1106 = vmatprep.mubr.msk.f32.mxu1 %vm1201_vm0, %v2025_v2  ;;  %v538_v15 = vadd.f32 %v513_v53, %v384_v13 }
 0x177   :  { %v654_v10 = vmul.f32 %v1660_v1, %v582_v63 }
 0x179   :  { %v679_v48 = vadd.f32 %v654_v10, %v525_v44 }
 0x17b   :  { %v704_v16 = vmax.f32 %v679_v48, 0.0  ;;  %v176_v28 = vpop.permute.xlu1 %175 }
 0x17c   :  { %v206_v30 = vmul.f32 %v1565_v6, %v176_v28 }
 0x17d   :  { %1068 = vmatmul.mubr.f32.gmra.mxu0 %v704_v16 }
 0x17e   :  { %1070 = vmatprep.mubr.msk.f32.mxu0 %vm1201_vm0, %v2025_v2  ;;  %v231_v32 = vadd.f32 %v1585_v23, %v206_v30  ;;  %v1876_v23 = vld [vmem:[%s2007_s4] ss:$0 sm:$0xff] }
 0x180   :  { %v432_v55 = vpop.permute.xlu1 %431 }
 0x181   :  { %v501_v12 = vmul.f32 %v1577_v20, %v432_v55 }
 0x183   :  { %v526_v27 = vadd.f32 %v501_v12, %v372_v45 }
 0x185   :  { %v282_v35 = vpop.permute.xlu1 %281  ;;  %v680_v33 = vadd.f32 %v655_v37, %v526_v27 }
 0x186   :  { %v348_v5 = vmul.f32 %v1580_v22, %v282_v35 }
 0x187   :  { %v705_v4 = vmax.f32 %v680_v33, 0.0 }
 0x188   :  { %v373_v17 = vadd.f32 %v348_v5, %v219_v49 }
 0x189   :  { %1071 = vmatmul.mubr.f32.gmra.mxu0 %v705_v4  ;;  %v330_v56 = vpop.permute.xlu1 %329 }
 0x18a   :  { %1073 = vmatprep.mubr.msk.f32.mxu0 %vm1201_vm0, %v2025_v2  ;;  %v360_v14 = vmul.f32 %v1580_v22, %v330_v56 }
 0x18c   :  { %v385_v6 = vadd.f32 %v360_v14, %v231_v32 }
 0x18e   :  { %v634_v42 = vpop.permute.xlu1 %633  ;;  %v539_v22 = vadd.f32 %v514_v18, %v385_v6 }
 0x18f   :  { %v667_v52 = vmul.f32 %v1660_v1, %v634_v42 }
 0x191   :  { %v692_v31 = vadd.f32 %v667_v52, %v538_v15 }
 0x193   :  { %v717_v39 = vmax.f32 %v692_v31, 0.0  ;;  %v436_v58 = vpop.permute.xlu1 %435 }
 0x194   :  { %v502_v8 = vmul.f32 %v1577_v20, %v436_v58 }
 0x195   :  { %1107 = vmatmul.mubr.f32.gmra.mxu1 %v717_v39 }
 0x196   :  { %1109 = vmatprep.mubr.msk.f32.mxu1 %vm1201_vm0, %v2025_v2  ;;  %v527_v3 = vadd.f32 %v502_v8, %v373_v17 }
 0x198   :  { %v590_v51 = vpop.permute.xlu1 %589 }
 0x199   :  { %v656_v61 = vmul.f32 %v1660_v1, %v590_v51 }
 0x19b   :  { %v681_v40 = vadd.f32 %v656_v61, %v527_v3 }
 0x19c   :  { %v638_v60 = vpop.permute.xlu1 %637 }
 0x19d   :  { %v706_v38 = vmax.f32 %v681_v40, 0.0  ;;  %v668_v0 = vmul.f32 %v1660_v1, %v638_v60 }
 0x19f   :  { %v693_v50 = vadd.f32 %v668_v0, %v539_v22  ;;  %1074 = vmatmul.mubr.f32.gmra.mxu0 %v706_v38 }
 0x1a1   :  { %v718_v21 = vmax.f32 %v693_v50, 0.0 }
 0x1a3   :  { %1110 = vmatmul.mubr.f32.gmra.mxu1 %v718_v21 }
 0x1a7   :  { %v808_v2 = vpop.f32.mrf.mxu0 }
 0x1a8   :  { %v809_v20 = vadd.f32 %v1876_v23, %v808_v2 }
 0x1a9   :  { %v1039_v11 = vpop.f32.mrf.mxu0 }
 0x1aa   :  { %933 = vst.msk [vmem:[%s2008_s5] sm:$0xff] %vm932_vm1, %v809_v20 }
 0x1ab   :  { %v813_v1 = vpop.f32.mrf.mxu0  ;;  %v873_v43 = vpop.f32.mrf.mxu1 }
 0x1ac   :  { %v814_v59 = vadd.f32 %v1876_v23, %v813_v1  ;;  %v874_v26 = vadd.f32 %v1876_v23, %v873_v43 }
 0x1ad   :  { %v1042_v63 = vpop.f32.mrf.mxu0  ;;  %v1078_v44 = vpop.f32.mrf.mxu1 }
 0x1ae   :  { %934 = vst.msk [vmem:[%s2008_s5 + $0x8] sm:$0xff] %vm932_vm1, %v814_v59  ;;  %946 = vst.msk [vmem:[%s2008_s5 + $0x68] sm:$0xff] %vm932_vm1, %v874_v26 }
 0x1af   :  { %v818_v10 = vpop.f32.mrf.mxu0  ;;  %v878_v48 = vpop.f32.mrf.mxu1 }
 0x1b0   :  { %v819_v47 = vadd.f32 %v1876_v23, %v818_v10  ;;  %v879_v9 = vadd.f32 %v1876_v23, %v878_v48 }
 0x1b1   :  { %v1045_v16 = vpop.f32.mrf.mxu0  ;;  %v1081_v28 = vpop.f32.mrf.mxu1 }
 0x1b2   :  { %935 = vst.msk [vmem:[%s2008_s5 + $0x10] sm:$0xff] %vm932_vm1, %v819_v47  ;;  %947 = vst.msk [vmem:[%s2008_s5 + $0x70] sm:$0xff] %vm932_vm1, %v879_v9 }
 0x1b3   :  { %v823_v36 = vpop.f32.mrf.mxu0  ;;  %v883_v25 = vpop.f32.mrf.mxu1 }
 0x1b4   :  { %v824_v57 = vadd.f32 %v1876_v23, %v823_v36  ;;  %v884_v54 = vadd.f32 %v1876_v23, %v883_v25 }
 0x1b5   :  { %v1048_v55 = vpop.f32.mrf.mxu0  ;;  %v1084_v45 = vpop.f32.mrf.mxu1 }
 0x1b6   :  { %936 = vst.msk [vmem:[%s2008_s5 + $0x18] sm:$0xff] %vm932_vm1, %v824_v57  ;;  %948 = vst.msk [vmem:[%s2008_s5 + $0x78] sm:$0xff] %vm932_vm1, %v884_v54 }
 0x1b9   :  { %v888_v12 = vpop.f32.mrf.mxu1 }
 0x1ba   :  { %v889_v37 = vadd.f32 %v1876_v23, %v888_v12 }
 0x1bb   :  { %v1087_v27 = vpop.f32.mrf.mxu1 }
 0x1bc   :  { %949 = vst.msk [vmem:[%s2008_s5 + $0x80] sm:$0xff] %vm932_vm1, %v889_v37 }
 0x1c1   :  { %v828_v7 = vpop.f32.mrf.mxu0 }
 0x1c2   :  { %v829_v62 = vadd.f32 %v1876_v23, %v828_v7 }
 0x1c3   :  { %v1051_v35 = vpop.f32.mrf.mxu0 }
 0x1c4   :  { %937 = vst.msk [vmem:[%s2008_s5 + $0x20] sm:$0xff] %vm932_vm1, %v829_v62 }
 0x1cc   :  { %v893_v33 = vpop.f32.mrf.mxu1 }
 0x1cd   :  { %v894_v24 = vadd.f32 %v1876_v23, %v893_v33 }
 0x1ce   :  { %v1090_v4 = vpop.f32.mrf.mxu1 }
 0x1cf   :  { %950 = vst.msk [vmem:[%s2008_s5 + $0x88] sm:$0xff] %vm932_vm1, %v894_v24 }
 0x1d4   :  { %v833_v29 = vpop.f32.mrf.mxu0 }
 0x1d5   :  { %v834_v41 = vadd.f32 %v1876_v23, %v833_v29 }
 0x1d6   :  { %v1054_v56 = vpop.f32.mrf.mxu0 }
 0x1d7   :  { %938 = vst.msk [vmem:[%s2008_s5 + $0x28] sm:$0xff] %vm932_vm1, %v834_v41 }
 0x1df   :  { %v898_v13 = vpop.f32.mrf.mxu1 }
 0x1e0   :  { %v899_v53 = vadd.f32 %v1876_v23, %v898_v13 }
 0x1e1   :  { %v1093_v42 = vpop.f32.mrf.mxu1 }
 0x1e2   :  { %951 = vst.msk [vmem:[%s2008_s5 + $0x90] sm:$0xff] %vm932_vm1, %v899_v53 }
 0x1e7   :  { %v838_v15 = vpop.f32.mrf.mxu0 }
 0x1e8   :  { %v839_v52 = vadd.f32 %v1876_v23, %v838_v15 }
 0x1e9   :  { %v1057_v34 = vpop.f32.mrf.mxu0 }
 0x1ea   :  { %939 = vst.msk [vmem:[%s2008_s5 + $0x30] sm:$0xff] %vm932_vm1, %v839_v52 }
 0x1f2   :  { %v903_v19 = vpop.f32.mrf.mxu1 }
 0x1f3   :  { %v904_v31 = vadd.f32 %v1876_v23, %v903_v19 }
 0x1f4   :  { %v1096_v30 = vpop.f32.mrf.mxu1 }
 0x1f5   :  { %952 = vst.msk [vmem:[%s2008_s5 + $0x98] sm:$0xff] %vm932_vm1, %v904_v31 }
 0x1fa   :  { %v843_v5 = vpop.f32.mrf.mxu0 }
 0x1fb   :  { %v844_v39 = vadd.f32 %v1876_v23, %v843_v5 }
 0x1fc   :  { %v1060_v58 = vpop.f32.mrf.mxu0 }
 0x1fd   :  { %940 = vst.msk [vmem:[%s2008_s5 + $0x38] sm:$0xff] %vm932_vm1, %v844_v39 }
 0x206   :  { %v848_v49 = vpop.f32.mrf.mxu0 }
 0x207   :  { %v849_v14 = vadd.f32 %v1876_v23, %v848_v49 }
 0x208   :  { %v1063_v8 = vpop.f32.mrf.mxu0 }
 0x209   :  { %941 = vst.msk [vmem:[%s2008_s5 + $0x40] sm:$0xff] %vm932_vm1, %v849_v14 }
 0x212   :  { %v908_v46 = vpop.f32.mrf.mxu1 }
 0x213   :  { %v909_v32 = vadd.f32 %v1876_v23, %v908_v46 }
 0x214   :  { %v1099_v17 = vpop.f32.mrf.mxu1 }
 0x215   :  { %953 = vst.msk [vmem:[%s2008_s5 + $0xa0] sm:$0xff] %vm932_vm1, %v909_v32 }
 0x226   :  { %v853_v51 = vpop.f32.mrf.mxu0 }
 0x227   :  { %v854_v6 = vadd.f32 %v1876_v23, %v853_v51 }
 0x228   :  { %v1066_v18 = vpop.f32.mrf.mxu0 }
 0x229   :  { %942 = vst.msk [vmem:[%s2008_s5 + $0x48] sm:$0xff] %vm932_vm1, %v854_v6 }
 0x22a   :  { %v913_v3 = vpop.f32.mrf.mxu1 }
 0x22b   :  { %v914_v61 = vadd.f32 %v1876_v23, %v913_v3 }
 0x22c   :  { %v1102_v40 = vpop.f32.mrf.mxu1 }
 0x22d   :  { %954 = vst.msk [vmem:[%s2008_s5 + $0xa8] sm:$0xff] %vm932_vm1, %v914_v61 }
 0x235   :  { %v918_v60 = vpop.f32.mrf.mxu1 }
 0x236   :  { %v919_v22 = vadd.f32 %v1876_v23, %v918_v60 }
 0x237   :  { %v1105_v38 = vpop.f32.mrf.mxu1 }
 0x238   :  { %955 = vst.msk [vmem:[%s2008_s5 + $0xb0] sm:$0xff] %vm932_vm1, %v919_v22 }
 0x23d   :  { %v858_v0 = vpop.f32.mrf.mxu0 }
 0x23e   :  { %v859_v50 = vadd.f32 %v1876_v23, %v858_v0 }
 0x23f   :  { %v1069_v21 = vpop.f32.mrf.mxu0 }
 0x240   :  { %943 = vst.msk [vmem:[%s2008_s5 + $0x50] sm:$0xff] %vm932_vm1, %v859_v50 }
 0x249   :  { %v863_v2 = vpop.f32.mrf.mxu0 }
 0x24a   :  { %v864_v20 = vadd.f32 %v1876_v23, %v863_v2 }
 0x24b   :  { %v1072_v11 = vpop.f32.mrf.mxu0 }
 0x24c   :  { %944 = vst.msk [vmem:[%s2008_s5 + $0x58] sm:$0xff] %vm932_vm1, %v864_v20 }
 0x255   :  { %v923_v1 = vpop.f32.mrf.mxu1 }
 0x256   :  { %v924_v43 = vadd.f32 %v1876_v23, %v923_v1 }
 0x257   :  { %v1108_v59 = vpop.f32.mrf.mxu1 }
 0x258   :  { %956 = vst.msk [vmem:[%s2008_s5 + $0xb8] sm:$0xff] %vm932_vm1, %v924_v43 }
 0x25f   :  { %v868_v26 = vpop.f32.mrf.mxu0 }
 0x260   :  { %v869_v63 = vadd.f32 %v1876_v23, %v868_v26 }
 0x261   :  { %v1075_v44 = vpop.f32.mrf.mxu0 }
 0x262   :  { %945 = vst.msk [vmem:[%s2008_s5 + $0x60] sm:$0xff] %vm932_vm1, %v869_v63 }
 0x263   :  { %v928_v10 = vpop.f32.mrf.mxu1 }
 0x264   :  { %v929_v48 = vadd.f32 %v1876_v23, %v928_v10 }
 0x265   :  { %v1111_v47 = vpop.f32.mrf.mxu1 }
 0x266   :  { %957 = vst.msk [vmem:[%s2008_s5 + $0xc0] sm:$0xff] %vm932_vm1, %v929_v48 }

</bundles_post_ra>
